<compile_context>
chip_gen: v6e
topology: v6e:2x2x1
jax: 0.10.0
libtpu: 0.0.40
codegen_flags: <defaults>
</compile_context>

<pallas_src>
import functools

import jax
import jax.numpy as jnp
from jax.experimental import pallas as pl
from jax.experimental.pallas import tpu as pltpu

_LANES = 128
_SUBLANES = 8


def _round_up(n: int, m: int) -> int:
    return ((n + m - 1) // m) * m


def _cdiv(a: int, b: int) -> int:
    return -(-a // b)


def _detect_bf16_elementwise() -> bool:
    """bf16 VPU is available on v6e/v7x; v5e and older lack it."""
    try:
        kind = jax.devices()[0].device_kind.lower()
    except Exception:
        return False
    return not any(tag in kind for tag in ("v2", "v3", "v4", "v5"))


_BF16_ELEMENTWISE = _detect_bf16_elementwise()


def _mlp_kernel(x_ref, w1_ref, w2_ref, w3_ref, b_ref, o_ref, *,
                ew_dtype, out_size):
    """One batch tile of the 3-layer MLP (normalization pre-folded into W1/b1).

    x_ref : (tb, in_size)      f32
    w1_ref: (in_size, hid_pad) bf16   (normalization folded in)
    w2_ref: (hid_pad, hid_pad) bf16
    w3_ref: (hid_pad, out_size) bf16
    b_ref : (3, hid_pad)       f32    rows = b1', b2, b3 (b3 in first out_size lanes)
    o_ref : (tb, out_size)     f32
    """
    b1 = b_ref[0:1, :].astype(ew_dtype)
    b2 = b_ref[1:2, :].astype(ew_dtype)
    b3 = b_ref[2:3, :out_size]                      # f32, final add stays f32

    # Layer 1: x @ W1' + b1', ReLU.  bf16 MXU operands, f32 accumulate.
    h = jnp.dot(x_ref[...].astype(jnp.bfloat16), w1_ref[...],
                preferred_element_type=jnp.float32)
    h = jnp.maximum(h.astype(ew_dtype) + b1, 0).astype(jnp.bfloat16)

    # Layer 2: Linear(hid_pad -> hid_pad) + ReLU.
    h = jnp.dot(h, w2_ref[...], preferred_element_type=jnp.float32)
    h = jnp.maximum(h.astype(ew_dtype) + b2, 0).astype(jnp.bfloat16)

    # Output layer: narrow (tb, out_size) result, f32 bias add, direct store.
    o = jnp.dot(h, w3_ref[...], preferred_element_type=jnp.float32) + b3
    o_ref[...] = o.astype(o_ref.dtype)


def _choose_batch_tile(B: int, *, cap: int = 1024, target_steps: int = 4) -> int:
    """Largest-reasonable tile: >= target_steps grid steps (>=2 per TC on v7x)
    when B allows it, multiple of 8 sublanes, capped so per-tile VMEM stays
    tiny even on v7x."""
    tb = _round_up(max(1, _cdiv(B, target_steps)), _SUBLANES)
    return max(_SUBLANES, min(cap, tb))


def mlp_pallas(x_last, w1, w2, w3, bias, *, out_size, batch_tile=None):
    """x_last: (B, in_size) f32.  Returns (B, out_size) f32."""
    B, in_size = x_last.shape
    hid_pad = w2.shape[0]
    ew_dtype = jnp.bfloat16 if _BF16_ELEMENTWISE else jnp.float32

    tb = batch_tile if batch_tile is not None else _choose_batch_tile(B)
    grid = _cdiv(B, tb)                 # partial last block handled by masking

    kernel = functools.partial(_mlp_kernel, ew_dtype=ew_dtype, out_size=out_size)

    # Small resident operands: full-array blocks with constant index_maps.
    def const(a):
        return pl.BlockSpec(a.shape, lambda i: tuple(0 for _ in a.shape))

    cost = pl.CostEstimate(
        flops=2 * B * (in_size * hid_pad + hid_pad * hid_pad + hid_pad * out_size),
        transcendentals=0,
        bytes_accessed=(B * (in_size + out_size) * 4
                        + (w1.size + w2.size + w3.size) * 2
                        + bias.size * 4),
    )

    return pl.pallas_call(
        kernel,
        out_shape=jax.ShapeDtypeStruct((B, out_size), jnp.float32),
        grid_spec=pltpu.PrefetchScalarGridSpec(
            num_scalar_prefetch=0,
            grid=(grid,),
            in_specs=[
                pl.BlockSpec((tb, in_size), lambda i: (i, 0)),   # x tile
                const(w1), const(w2), const(w3), const(bias),
            ],
            out_specs=pl.BlockSpec((tb, out_size), lambda i: (i, 0)),
        ),
        compiler_params=pltpu.CompilerParams(
            dimension_semantics=("parallel",),     # v7x: split tiles across 2 TCs
            vmem_limit_bytes=32 * 1024 * 1024,
        ),
        cost_estimate=cost,
    )(x_last, w1, w2, w3, bias)


@functools.partial(jax.jit, static_argnames=("out_size",))
def mlp_forward(x, carry, mean, std, params, *, out_size):
    """Equivalent of MLP.forward(x, carry).

    x:     (B, T, in_size) f32
    carry: passed through unchanged
    params: ((w1,b1),(w2,b2),(w3,b3)) in f32, weights stored (fan_in, fan_out),
            hidden dim padded to 128 lanes.
    returns (y, carry) with y of shape (B, 1, out_size)
    """
    (w1, b1), (w2, b2), (w3, b3) = params
    hid_pad = w2.shape[0]
    if out_size > hid_pad:
        raise ValueError("bias packing assumes out_size <= padded hidden size")

    x_last = x[:, -1, :]                       # last time step (plain-JAX glue)

    # Fold normalization into layer 1:  ((x-mean)/std) @ W1 + b1  ==  x @ W1' + b1'
    inv_std = 1.0 / std
    w1f = (inv_std.reshape(-1, 1) * w1)
    b1f = b1 - jnp.dot(mean * inv_std, w1)

    # Pack the three biases into a single small resident operand.
    bias = jnp.zeros((3, hid_pad), jnp.float32)
    bias = bias.at[0].set(b1f).at[1].set(b2).at[2, :out_size].set(b3)

    y = mlp_pallas(x_last,
                   w1f.astype(jnp.bfloat16),
                   w2.astype(jnp.bfloat16),
                   w3.astype(jnp.bfloat16),
                   bias, out_size=out_size)
    return y[:, None, :], carry                # unsqueeze(1)


def _init_linear(key, fan_in, fan_out, pad_in, pad_out):
    """nn.Linear-style init, stored f32 as (fan_in, fan_out) so the kernel does
    x @ W + b (same math as PyTorch's x @ W.T + b).  Zero padding is exact:
    padded hidden units have zero in/out weights and zero bias."""
    kw, kb = jax.random.split(key)
    bound = (1.0 / fan_in) ** 0.5
    w = jax.random.uniform(kw, (fan_in, fan_out), jnp.float32, -bound, bound)
    b = jax.random.uniform(kb, (fan_out,), jnp.float32, -bound, bound)
    w_p = jnp.zeros((pad_in, pad_out), jnp.float32).at[:fan_in, :fan_out].set(w)
    b_p = jnp.zeros((pad_out,), jnp.float32).at[:fan_out].set(b)
    return w_p, b_p


def _reference_kernel_math(x, mean, std, params, out_size, ew_dtype):
    """Pure-JAX reference mirroring the kernel math exactly (fold + bf16 MXU
    operands + f32 accumulate + ew_dtype element-wise chain)."""
    (w1, b1), (w2, b2), (w3, b3) = params
    x_last = x[:, -1, :]
    inv_std = 1.0 / std
    w1f = (inv_std.reshape(-1, 1) * w1).astype(jnp.bfloat16)
    b1f = b1 - jnp.dot(mean * inv_std, w1)
    h = jnp.dot(x_last.astype(jnp.bfloat16), w1f, preferred_element_type=jnp.float32)
    h = jnp.maximum(h.astype(ew_dtype) + b1f.astype(ew_dtype), 0).astype(jnp.bfloat16)
    h = jnp.dot(h, w2.astype(jnp.bfloat16), preferred_element_type=jnp.float32)
    h = jnp.maximum(h.astype(ew_dtype) + b2.astype(ew_dtype), 0).astype(jnp.bfloat16)
    o = jnp.dot(h, w3.astype(jnp.bfloat16), preferred_element_type=jnp.float32) + b3
    return o[:, None, :out_size]


def _reference_f32(x, mean, std, params, out_size):
    (w1, b1), (w2, b2), (w3, b3) = params
    xn = (x[:, -1, :] - mean) / std
    h = jnp.maximum(xn @ w1 + b1, 0.0)
    h = jnp.maximum(h @ w2 + b2, 0.0)
    return (h @ w3 + b3)[:, None, :out_size]


if __name__ == "__main__":
    # Small shapes consistent with the module's forward.
    B, T = 2, 8
    in_size, hidden_size, out_size = 16, 32, 16
    hid_pad = _round_up(hidden_size, _LANES)   # 128

    key = jax.random.PRNGKey(0)
    kx, k1, k2, k3 = jax.random.split(key, 4)

    x = jax.random.normal(kx, (B, T, in_size), jnp.float32)
    carry = jnp.zeros((B, 1), jnp.float32)

    # DeepLearnableModel.__init__: mean = ones(in_size), std = ones(in_size)
    mean = jnp.ones((in_size,), jnp.float32)
    std = jnp.ones((in_size,), jnp.float32)

    params = (
        _init_linear(k1, in_size, hidden_size, in_size, hid_pad),
        _init_linear(k2, hidden_size, hidden_size, hid_pad, hid_pad),
        _init_linear(k3, hidden_size, out_size, hid_pad, out_size),
    )

    ew_dtype = jnp.bfloat16 if _BF16_ELEMENTWISE else jnp.float32

    y, carry_out = mlp_forward(x, carry, mean, std, params, out_size=out_size)
    y = jax.block_until_ready(y)

    ref = _reference_kernel_math(x, mean, std, params, out_size, ew_dtype)
    ref_f32 = _reference_f32(x, mean, std, params, out_size)
    assert y.shape == (B, 1, out_size), y.shape
    assert carry_out.shape == carry.shape
    assert jnp.allclose(y, ref, atol=1e-4, rtol=1e-4), "mismatch vs kernel-math reference"
    assert jnp.allclose(y, ref_f32, atol=5e-2, rtol=5e-2), "mismatch vs f32 reference"

    # Multi-step grid with a partial (masked) last block: B=300 -> tb=80, grid=4.
    B2 = 300
    x2 = jax.random.normal(jax.random.PRNGKey(1), (B2, T, in_size), jnp.float32)
    carry2 = jnp.zeros((B2, 1), jnp.float32)
    y2, _ = mlp_forward(x2, carry2, mean, std, params, out_size=out_size)
    y2 = jax.block_until_ready(y2)
    ref2 = _reference_kernel_math(x2, mean, std, params, out_size, ew_dtype)
    assert y2.shape == (B2, 1, out_size), y2.shape
    assert jnp.allclose(y2, ref2, atol=1e-4, rtol=1e-4), "mismatch vs reference (B=300)"

    # Exercise the 1024-row tile cap: B=4500 -> tb=1024, grid=5 (last block partial).
    B3 = 4500
    x3 = jax.random.normal(jax.random.PRNGKey(2), (B3, T, in_size), jnp.float32)
    carry3 = jnp.zeros((B3, 1), jnp.float32)
    y3, _ = mlp_forward(x3, carry3, mean, std, params, out_size=out_size)
    y3 = jax.block_until_ready(y3)
    ref3 = _reference_kernel_math(x3, mean, std, params, out_size, ew_dtype)
    assert y3.shape == (B3, 1, out_size), y3.shape
    assert jnp.allclose(y3, ref3, atol=1e-4, rtol=1e-4), "mismatch vs reference (B=4500)"

    print("KERNEL_OK")
</pallas_src>

<mosaic_0001>
module attributes {stable_mosaic.version = 11 : i64} {
  func.func @_mlp_kernel(%arg0: i32, %arg1: memref<8x16xf32, #tpu.memory_space<vmem>>, %arg2: memref<16x128xbf16, #tpu.memory_space<vmem>>, %arg3: memref<128x128xbf16, #tpu.memory_space<vmem>>, %arg4: memref<128x16xbf16, #tpu.memory_space<vmem>>, %arg5: memref<3x128xf32, #tpu.memory_space<vmem>>, %arg6: memref<8x16xf32, #tpu.memory_space<vmem>>) attributes {dimension_semantics = [#tpu.dimension_semantics<parallel>], iteration_bounds = array<i64: 1>, scalar_prefetch = 0 : i64, scratch_operands = 0 : i64, tpu.core_type = #tpu.core_type<tc>, window_params = [{transform_indices = @transform_0, window_bounds = array<i64: 8, 16>}, {pipeline_mode = #tpu.pipeline_mode<synchronous>, transform_indices = @transform_1, window_bounds = array<i64: 16, 128>}, {pipeline_mode = #tpu.pipeline_mode<synchronous>, transform_indices = @transform_2, window_bounds = array<i64: 128, 128>}, {pipeline_mode = #tpu.pipeline_mode<synchronous>, transform_indices = @transform_3, window_bounds = array<i64: 128, 16>}, {pipeline_mode = #tpu.pipeline_mode<synchronous>, transform_indices = @transform_4, window_bounds = array<i64: 3, 128>}, {transform_indices = @transform_5, window_bounds = array<i64: 8, 16>}]} {
    %c0 = arith.constant 0 : index
    %c0_0 = arith.constant 0 : index
    %0 = vector.load %arg5[%c0, %c0_0] : memref<3x128xf32, #tpu.memory_space<vmem>>, vector<1x128xf32>
    %1 = arith.truncf %0 : vector<1x128xf32> to vector<1x128xbf16>
    %c1 = arith.constant 1 : index
    %c0_1 = arith.constant 0 : index
    %2 = vector.load %arg5[%c1, %c0_1] : memref<3x128xf32, #tpu.memory_space<vmem>>, vector<1x128xf32>
    %3 = arith.truncf %2 : vector<1x128xf32> to vector<1x128xbf16>
    %c2 = arith.constant 2 : index
    %c0_2 = arith.constant 0 : index
    %4 = vector.load %arg5[%c2, %c0_2] : memref<3x128xf32, #tpu.memory_space<vmem>>, vector<1x16xf32>
    %c0_3 = arith.constant 0 : index
    %c0_4 = arith.constant 0 : index
    %5 = vector.load %arg1[%c0_3, %c0_4] : memref<8x16xf32, #tpu.memory_space<vmem>>, vector<8x16xf32>
    %6 = arith.truncf %5 : vector<8x16xf32> to vector<8x16xbf16>
    %c0_5 = arith.constant 0 : index
    %c0_6 = arith.constant 0 : index
    %7 = vector.load %arg2[%c0_5, %c0_6] : memref<16x128xbf16, #tpu.memory_space<vmem>>, vector<16x128xbf16>
    %cst = arith.constant dense<0.000000e+00> : vector<8x128xf32>
    %8 = tpu.matmul %6, %7, %cst {dimension_numbers = #tpu.dot_dimension_numbers<[1], [0], [0], [1], [0, 0, 1, 1], [], []>} : vector<8x16xbf16>, vector<16x128xbf16>, vector<8x128xf32> -> vector<8x128xf32>
    %9 = arith.truncf %8 : vector<8x128xf32> to vector<8x128xbf16>
    %10 = vector.broadcast %1 : vector<1x128xbf16> to vector<8x128xbf16>
    %11 = arith.addf %9, %10 : vector<8x128xbf16>
    %cst_7 = arith.constant 0.000000e+00 : bf16
    %12 = vector.broadcast %cst_7 : bf16 to vector<8x128xbf16>
    %13 = arith.maximumf %11, %12 : vector<8x128xbf16>
    %c0_8 = arith.constant 0 : index
    %c0_9 = arith.constant 0 : index
    %14 = vector.load %arg3[%c0_8, %c0_9] : memref<128x128xbf16, #tpu.memory_space<vmem>>, vector<128x128xbf16>
    %cst_10 = arith.constant dense<0.000000e+00> : vector<8x128xf32>
    %15 = tpu.matmul %13, %14, %cst_10 {dimension_numbers = #tpu.dot_dimension_numbers<[1], [0], [0], [1], [0, 0, 1, 1], [], []>} : vector<8x128xbf16>, vector<128x128xbf16>, vector<8x128xf32> -> vector<8x128xf32>
    %16 = arith.truncf %15 : vector<8x128xf32> to vector<8x128xbf16>
    %17 = vector.broadcast %3 : vector<1x128xbf16> to vector<8x128xbf16>
    %18 = arith.addf %16, %17 : vector<8x128xbf16>
    %cst_11 = arith.constant 0.000000e+00 : bf16
    %19 = vector.broadcast %cst_11 : bf16 to vector<8x128xbf16>
    %20 = arith.maximumf %18, %19 : vector<8x128xbf16>
    %c0_12 = arith.constant 0 : index
    %c0_13 = arith.constant 0 : index
    %21 = vector.load %arg4[%c0_12, %c0_13] : memref<128x16xbf16, #tpu.memory_space<vmem>>, vector<128x16xbf16>
    %cst_14 = arith.constant dense<0.000000e+00> : vector<8x16xf32>
    %22 = tpu.matmul %20, %21, %cst_14 {dimension_numbers = #tpu.dot_dimension_numbers<[1], [0], [0], [1], [0, 0, 1, 1], [], []>} : vector<8x128xbf16>, vector<128x16xbf16>, vector<8x16xf32> -> vector<8x16xf32>
    %23 = vector.broadcast %4 : vector<1x16xf32> to vector<8x16xf32>
    %24 = arith.addf %22, %23 : vector<8x16xf32>
    %c0_15 = arith.constant 0 : index
    %c0_16 = arith.constant 0 : index
    %25 = vector.load %arg6[%c0_15, %c0_16] : memref<8x16xf32, #tpu.memory_space<vmem>>, vector<8x16xf32>
    tpu.vector_store %arg6[%c0_15, %c0_16], %24 {strides = array<i32>} : memref<8x16xf32, #tpu.memory_space<vmem>>, vector<8x16xf32>,
    return
  }
  func.func @transform_0(%arg0: i32) -> (i32, i32) {
    %c0_i32 = arith.constant 0 : i32
    %c0_i32_0 = arith.constant 0 : i32
    return %arg0, %c0_i32 : i32, i32
  }
  func.func @transform_1(%arg0: i32) -> (i32, i32) {
    %c0_i32 = arith.constant 0 : i32
    %c0_i32_0 = arith.constant 0 : i32
    %c0_i32_1 = arith.constant 0 : i32
    return %c0_i32, %c0_i32_0 : i32, i32
  }
  func.func @transform_2(%arg0: i32) -> (i32, i32) {
    %c0_i32 = arith.constant 0 : i32
    %c0_i32_0 = arith.constant 0 : i32
    %c0_i32_1 = arith.constant 0 : i32
    return %c0_i32, %c0_i32_0 : i32, i32
  }
  func.func @transform_3(%arg0: i32) -> (i32, i32) {
    %c0_i32 = arith.constant 0 : i32
    %c0_i32_0 = arith.constant 0 : i32
    %c0_i32_1 = arith.constant 0 : i32
    return %c0_i32, %c0_i32_0 : i32, i32
  }
  func.func @transform_4(%arg0: i32) -> (i32, i32) {
    %c0_i32 = arith.constant 0 : i32
    %c0_i32_0 = arith.constant 0 : i32
    %c0_i32_1 = arith.constant 0 : i32
    return %c0_i32, %c0_i32_0 : i32, i32
  }
  func.func @transform_5(%arg0: i32) -> (i32, i32) {
    %c0_i32 = arith.constant 0 : i32
    %c0_i32_0 = arith.constant 0 : i32
    return %arg0, %c0_i32 : i32, i32
  }
}

</mosaic_0001>

<bundles_post_ra>
// kernel: mlp_forward.1
= control target key start
LH: loop header
LB: loop body
LE: loop exit
PB: predicated region body
PF: predicated region fallthrough
CT: control target
= control target key end

     0   :  { %10 = vsyncpa [#allocation3], 0  ;;  %v460_v1 = vmov 0.0   ;;  %vm37_vm0 = vcmask 130048   ;;  %vm461_vm1 = vmmov 0   ;;  %v85_v18 = vlaneseq  ;;  %s584_s0 = inlined_call_operand.vmem [shape: f32[2,16], index: 0, kind: input, shape index: {}]   ;;  %s585_s1 = inlined_call_operand.vmem [shape: bf16[16,128], index: 1, kind: input, shape index: {}]   ;;  %s586_s2 = inlined_call_operand.vmem [shape: bf16[128,128], index: 2, kind: input, shape index: {}]   ;;  %s587_s3 = inlined_call_operand.vmem [shape: bf16[128,16], index: 3, kind: input, shape index: {}]   ;;  %s588_s4 = inlined_call_operand.vmem [shape: f32[3,128], index: 4, kind: input, shape index: {}]   ;;  %s589_s5 = inlined_call_operand.hbm [shape: f32[2,16], index: 5, kind: output, shape index: {}]  }
   0x1   :  { %v421_v0 = vld [vmem:[%s585_s1] sm:$0xff]   ;;  %369 = vmatprep.subr.bf16.mxu0 %v460_v1  ;;  %375 = vmatprep.subr.bf16.mxu1 %v460_v1  ;;  %v422_v3 = vld [vmem:[%s586_s2 + $0x38] sm:$0xff]   ;;  %v423_v5 = vld [vmem:[%s586_s2 + $0x30] sm:$0xff]   ;;  %v462_v30 = vmov 0  }
   0x2   :  { %v27_v2 = vld [vmem:[%s584_s0] sm:$0xff]  ;;  %370 = vmatpush3.bf16.msra.mxu0 %v421_v0  ;;  %371 = vmatprep.mubr.msk.bf16.mxu0 %vm461_vm1, %v460_v1  ;;  %v424_v6 = vld [vmem:[%s586_s2 + $0x28] sm:$0xff]   ;;  %v426_v8 = vld [vmem:[%s586_s2 + $0x18] sm:$0xff]   ;;  %v86_v21 = vshrl.u32 %v85_v18, 7 }
   0x3   :  { %v28_v4 = vpack.c.bf16 %v27_v2, %v27_v2  ;;  %376 = vmatpush3.bf16.msra.mxu1 %v422_v3  ;;  %391 = vmatprep.mubr.msk.bf16.mxu1 %vm461_vm1, %v460_v1  ;;  %v425_v7 = vld [vmem:[%s586_s2 + $0x20] sm:$0xff]   ;;  %v427_v9 = vld [vmem:[%s586_s2 + $0x10] sm:$0xff]   ;;  %v428_v10 = vld [vmem:[%s586_s2 + $0x8] sm:$0xff]  }
   0x4   :  { %377 = vmatprep.subr.bf16.mxu1 %v460_v1  ;;  %395 = vmatprep.subr.bf16.mxu0 %v460_v1  ;;  %v429_v11 = vld [vmem:[%s586_s2] sm:$0xff]   ;;  %v430_v12 = vld [vmem:[%s587_s3 + $0x38] sm:$0xff]   ;;  %v431_v13 = vld [vmem:[%s587_s3 + $0x30] sm:$0xff]   ;;  %v87_v23 = vsub.s32 0, %v86_v21 }
   0x5   :  { %372 = vmatmul.mubr.msk.bf16.vlgmr.msra.gmra.mxu0 %vm37_vm0, %v28_v4  ;;  %v432_v14 = vld [vmem:[%s587_s3 + $0x28] sm:$0xff]   ;;  %v433_v15 = vld [vmem:[%s587_s3 + $0x20] sm:$0xff]   ;;  %v434_v16 = vld [vmem:[%s587_s3 + $0x18] sm:$0xff]  }
   0x6   :  { %411 = vmatprep.mubr.msk.bf16.mxu0 %vm461_vm1, %v460_v1  ;;  %396 = vmatpush3.bf16.msra.mxu0 %v430_v12  ;;  %v435_v17 = vld [vmem:[%s587_s3 + $0x10] sm:$0xff]   ;;  %v22_v19 = vld [vmem:[%s588_s4] sm:$0x1]  ;;  %v436_v33 = vld [vmem:[%s587_s3 + $0x8] sm:$0xff]  }
   0x7   :  { %378 = vmatpush3.bf16.msra.mxu1 %v423_v5  ;;  %397 = vmatprep.subr.bf16.mxu0 %v460_v1  ;;  %v23_v20 = vpack.c.bf16 %v22_v19, %v22_v19  ;;  %v437_v34 = vld [vmem:[%s587_s3] sm:$0xff]  }
   0x8   :  { %379 = vmatprep.subr.bf16.mxu1 %v460_v1  ;;  %v24_v35 = vld [vmem:[%s588_s4 + $0x1] sm:$0x1]  ;;  %v340_v46 = vld [vmem:[%s588_s4 + $0x2] ss:$0 sm:$0xff] }
   0x9   :  { %v83_v22 = vpack.i.b16 %v23_v20, %v23_v20  ;;  %v25_v36 = vpack.c.bf16 %v24_v35, %v24_v35 }
   0xa   :  { %398 = vmatpush3.bf16.msra.mxu0 %v431_v13 }
   0xb   :  { %380 = vmatpush3.bf16.msra.mxu1 %v424_v6  ;;  %399 = vmatprep.subr.bf16.mxu0 %v460_v1  ;;  %v88_v24 = vrot.slane %v83_v22, %v87_v23  ;;  %v197_v37 = vpack.i.b16 %v25_v36, %v25_v36 }
   0xc   :  { %381 = vmatprep.subr.bf16.mxu1 %v460_v1 }
   0xd   :  { %v202_v38 = vrot.slane %v197_v37, %v87_v23 }
   0xe   :  { %400 = vmatpush3.bf16.msra.mxu0 %v432_v14 }
   0xf   :  { %382 = vmatpush3.bf16.msra.mxu1 %v425_v7  ;;  %401 = vmatprep.subr.bf16.mxu0 %v460_v1 }
  0x10   :  { %383 = vmatprep.subr.bf16.mxu1 %v460_v1 }
  0x12   :  { %402 = vmatpush3.bf16.msra.mxu0 %v433_v15 }
  0x13   :  { %384 = vmatpush3.bf16.msra.mxu1 %v426_v8  ;;  %403 = vmatprep.subr.bf16.mxu0 %v460_v1 }
  0x14   :  { %385 = vmatprep.subr.bf16.mxu1 %v460_v1 }
  0x16   :  { %404 = vmatpush3.bf16.msra.mxu0 %v434_v16 }
  0x17   :  { %386 = vmatpush3.bf16.msra.mxu1 %v427_v9  ;;  %405 = vmatprep.subr.bf16.mxu0 %v460_v1 }
  0x18   :  { %387 = vmatprep.subr.bf16.mxu1 %v460_v1 }
  0x1a   :  { %406 = vmatpush3.bf16.msra.mxu0 %v435_v17 }
  0x1b   :  { %388 = vmatpush3.bf16.msra.mxu1 %v428_v10  ;;  %407 = vmatprep.subr.bf16.mxu0 %v460_v1 }
  0x1c   :  { %389 = vmatprep.subr.bf16.mxu1 %v460_v1 }
  0x1e   :  { %408 = vmatpush3.bf16.msra.mxu0 %v436_v33 }
  0x1f   :  { %390 = vmatpush3.bf16.msra.mxu1 %v429_v11  ;;  %409 = vmatprep.subr.bf16.mxu0 %v460_v1 }
  0x22   :  { %410 = vmatpush3.bf16.msra.mxu0 %v437_v34 }
  0xc5   :  { %v75_v25 = vpop.f32.mrf.mxu0 }
  0xc6   :  { %v81_v26 = vpack.c.bf16 %v75_v25, %v75_v25 }
  0xc7   :  { %v373_v27 = vpop.f32.mrf.mxu0 }
  0xc8   :  { %v89_v28 = vadd.bf16 %v88_v24, %v81_v26 }
  0xc9   :  { %v78_v29 = vpop.f32.mrf.mxu0 }
  0xca   :  { %v90_v31 = vmax.bf16 %v462_v30, %v89_v28 }
  0xcb   :  { %v374_v32 = vpop.f32.mrf.mxu0 }
  0xcc   :  { %392 = vmatmul.mubr.bf16.vlgmr.msra.gmra.mxu1 %v90_v31 }
 0x18c   :  { %v189_v39 = vpop.f32.mrf.mxu1 }
 0x18d   :  { %v195_v40 = vpack.c.bf16 %v189_v39, %v189_v39 }
 0x18e   :  { %v393_v41 = vpop.f32.mrf.mxu1 }
 0x18f   :  { %v203_v42 = vadd.bf16 %v202_v38, %v195_v40 }
 0x190   :  { %v192_v43 = vpop.f32.mrf.mxu1 }
 0x191   :  { %v204_v44 = vmax.bf16 %v462_v30, %v203_v42 }
 0x192   :  { %v394_v45 = vpop.f32.mrf.mxu1 }
 0x193   :  { %412 = vmatmul.mubr.bf16.vlgmr.msra.gmra.mxu0 %v204_v44 }
 0x253   :  { %v307_v47 = vpop.f32.mrf.mxu0 }
 0x254   :  { %v308_v48 = vadd.f32 %v340_v46, %v307_v47 }
 0x255   :  { %v413_v49 = vpop.f32.mrf.mxu0 }
 0x256   :  { %313 = vst.msk [vmem:[#allocation2] sm:$0xff] %vm37_vm0, %v308_v48 }
 0x257   :  { %v310_v50 = vpop.f32.mrf.mxu0 }
 0x259   :  { %v414_v51 = vpop.f32.mrf.mxu0 }
 0x25a   :  { %318 = vsyncadd [#allocation3], 96  ;;  %s463_s3 = smov [#allocation2]  }
 0x25b   :  { %s319_s30 = sshll.u32 %s463_s3, 4  ;;  %s320_s30 = int_to_ptr.vmem [resolvable:$true] %s319_s30 }
 0x25c   :  { %s438_s6 = scalar_lea.vmem %s320_s30, 32  ;;  %s442_s7 = scalar_lea.vmem %s320_s30, 128 }
 0x25d   :  { %p439_p0 = scmp.ne.s32.totalorder %s320_s30, %s438_s6  ;;  %p443_p1 = scmp.lt.s32.totalorder %s320_s30, %s320_s30 }
 0x25e   :  { %p444_p2 = scmp.lt.s32.totalorder %s442_s7, %s438_s6 }
 0x260   :  { %p445_p3 = por %p444_p2, %p443_p1 }
 0x262   :  { %p446_p4 = pnand %p445_p3, %p439_p0 }
 0x264   :  { %449 = shalt.err (!%p446_p4)
}
 0x265   :  { %s464_s4 = smov 32   ;;  %s465_s8 = smov 2  }
 0x266   :  { %325 = dma.vmem_to_hbm [thread:$0]  %s320_s30, 32, %s589_s5, [#allocation3], %s464_s4, %s464_s4, %s465_s8  }
 0x267   :  { %458 = dma.done.wait [#allocation3], 128  }
 0x268   :  { %459 = vsyncadd [#allocation3], 4294967168 }
 0x269   :  { %329 = vsyncpa [#allocation3], 1 }

</bundles_post_ra>
